<compile_context>
chip_gen: v6e
topology: v6e:2x2x1
jax: 0.10.0
libtpu: 0.0.40
codegen_flags: <defaults>
</compile_context>

<pallas_src>
import jax
import jax.numpy as jnp
from jax.experimental import pallas as pl
from jax.experimental.pallas import tpu as pltpu


IN_FEATS = 28 * 28        # 784
OUT_FEATS = 10
OUT_PAD = 128             # lane-dense output block (wrapper slices back to 10)
H1, H2, H3 = 256, 128, 64


def _round_up(n, m):
    return ((n + m - 1) // m) * m


def mlp_kernel(x_ref,
               w1_ref, b1_ref,
               w2_ref, b2_ref,
               w3_ref, b3_ref,
               w4_ref, b4_ref,
               o_ref):
    # x arrives f32; cast to bf16 in-kernel (VPU work hidden under the x DMA).
    x = x_ref[...].astype(jnp.bfloat16)
    # fc1 + relu  (bf16 x bf16 -> f32 accumulate on the MXU, f32 bias/ReLU)
    h = jnp.dot(x, w1_ref[...], preferred_element_type=jnp.float32)
    h = jnp.maximum(h + b1_ref[...], 0.0).astype(jnp.bfloat16)
    # fc2 + relu
    h = jnp.dot(h, w2_ref[...], preferred_element_type=jnp.float32)
    h = jnp.maximum(h + b2_ref[...], 0.0).astype(jnp.bfloat16)
    # fc3 + relu
    h = jnp.dot(h, w3_ref[...], preferred_element_type=jnp.float32)
    h = jnp.maximum(h + b3_ref[...], 0.0).astype(jnp.bfloat16)
    # fc4 (no activation), lane-dense (TM, 128) store
    h = jnp.dot(h, w4_ref[...], preferred_element_type=jnp.float32)
    o_ref[...] = (h + b4_ref[...]).astype(o_ref.dtype)


def prepare_params(params):
    """One-time parameter prep (hoisted out of the per-call forward):
    bf16 weights, f32 biases, final layer zero-padded 10 -> 128 outputs."""
    (w1, b1), (w2, b2), (w3, b3), (w4, b4) = params
    w1b = w1.astype(jnp.bfloat16)                                   # (784, 256)
    w2b = w2.astype(jnp.bfloat16)                                   # (256, 128)
    w3b = w3.astype(jnp.bfloat16)                                   # (128, 64)
    w4p = jnp.zeros((H3, OUT_PAD), jnp.bfloat16).at[:, :OUT_FEATS].set(
        w4.astype(jnp.bfloat16))                                    # (64, 128)
    b4p = jnp.zeros((1, OUT_PAD), jnp.float32).at[:, :OUT_FEATS].set(b4)
    return (w1b, b1, w2b, b2, w3b, b3, w4p, b4p)


def _choose_tm(batch):
    if batch < 512:
        # single tile, just sublane-aligned
        return _round_up(max(batch, 8), 8)
    # >= 2 grid steps (two v7x TensorCores) with MXU-friendly multiples of 256,
    # capped at 1024 which already sits near the HBM roofline on v6e.
    return max(256, min(1024, 256 * pl.cdiv(batch, 2 * 256)))


@jax.jit
def simple_nn_forward(x_nchw, prepped):
    """x_nchw: (B, 1, 28, 28) float32.  Returns logits (B, 10) float32."""
    B = x_nchw.shape[0]
    x = x_nchw.reshape(B, IN_FEATS)          # same semantics as torch .view(-1, 784)

    w1b, b1, w2b, b2, w3b, b3, w4p, b4p = prepped

    TM = _choose_tm(B)
    # Only tiny, non-sublane-aligned batches get a few explicitly padded rows;
    # otherwise rely on Pallas' ragged last-block masking (no HBM copy of x).
    Brows = _round_up(B, 8)
    if Brows != B:
        x = jnp.pad(x, ((0, Brows - B), (0, 0)))
    grid = (pl.cdiv(Brows, TM),)

    x_spec = pl.BlockSpec((TM, IN_FEATS), lambda i: (i, 0))
    out_spec = pl.BlockSpec((TM, OUT_PAD), lambda i: (i, 0))

    def resident(shape):
        # full-array block + constant index_map -> stays resident in VMEM,
        # never re-DMA'd across batch tiles.
        return pl.BlockSpec(shape, lambda i: (0, 0))

    flops = 2 * Brows * (IN_FEATS * H1 + H1 * H2 + H2 * H3 + H3 * OUT_PAD)
    bytes_accessed = (
        Brows * IN_FEATS * 4                                   # x (f32 stream)
        + (w1b.size + w2b.size + w3b.size + w4p.size) * 2      # bf16 weights
        + (b1.size + b2.size + b3.size + b4p.size) * 4         # f32 biases
        + Brows * OUT_PAD * 4)                                 # f32 output

    out = pl.pallas_call(
        mlp_kernel,
        out_shape=jax.ShapeDtypeStruct((Brows, OUT_PAD), jnp.float32),
        grid=grid,
        in_specs=[
            x_spec,
            resident((IN_FEATS, H1)), resident((1, H1)),
            resident((H1, H2)),       resident((1, H2)),
            resident((H2, H3)),       resident((1, H3)),
            resident((H3, OUT_PAD)),  resident((1, OUT_PAD)),
        ],
        out_specs=out_spec,
        compiler_params=pltpu.CompilerParams(
            dimension_semantics=("parallel",),      # batch tiles shard across TCs (v7x)
            vmem_limit_bytes=32 * 1024 * 1024,      # ~12 MiB used at TM=1024; safe on v5e/v6e/v7x
        ),
        cost_estimate=pl.CostEstimate(
            flops=flops, transcendentals=0, bytes_accessed=bytes_accessed),
    )(x, w1b, b1, w2b, b2, w3b, b3, w4p, b4p)

    return out[:B, :OUT_FEATS]


def init_params(key):
    """Deterministic init mimicking nn.Linear's default U(-1/sqrt(fan_in), 1/sqrt(fan_in)).
    Weights stored as (in_features, out_features)."""
    dims = [(IN_FEATS, H1), (H1, H2), (H2, H3), (H3, OUT_FEATS)]
    params = []
    for (fan_in, fan_out) in dims:
        key, kw, kb = jax.random.split(key, 3)
        bound = 1.0 / jnp.sqrt(jnp.float32(fan_in))
        w = jax.random.uniform(kw, (fan_in, fan_out), jnp.float32, -bound, bound)
        b = jax.random.uniform(kb, (1, fan_out), jnp.float32, -bound, bound)
        params.append((w, b))
    return params


def reference_forward_bf16(x_nchw, params):
    """Pure-JAX reference with the same bf16 compute / f32-accumulate recipe."""
    x = x_nchw.reshape(x_nchw.shape[0], IN_FEATS).astype(jnp.bfloat16)
    (w1, b1), (w2, b2), (w3, b3), (w4, b4) = params

    def lin(h, w, b):
        return jnp.dot(h, w.astype(jnp.bfloat16),
                       preferred_element_type=jnp.float32) + b

    h = jnp.maximum(lin(x, w1, b1), 0.0).astype(jnp.bfloat16)
    h = jnp.maximum(lin(h, w2, b2), 0.0).astype(jnp.bfloat16)
    h = jnp.maximum(lin(h, w3, b3), 0.0).astype(jnp.bfloat16)
    return lin(h, w4, b4)


def reference_forward_f32(x_nchw, params):
    """Pure-f32 reference of the PyTorch forward pass (sanity check)."""
    x = x_nchw.reshape(x_nchw.shape[0], IN_FEATS)
    (w1, b1), (w2, b2), (w3, b3), (w4, b4) = params
    h = jnp.maximum(x @ w1 + b1, 0.0)
    h = jnp.maximum(h @ w2 + b2, 0.0)
    h = jnp.maximum(h @ w3 + b3, 0.0)
    return h @ w4 + b4


if __name__ == "__main__":
    key = jax.random.PRNGKey(0)
    key, kx = jax.random.split(key)

    # Small MNIST-like batch: NCHW (B=2, C=1, H=28, W=28)
    x = jax.random.normal(kx, (2, 1, 28, 28), jnp.float32)
    params = init_params(key)
    prepped = prepare_params(params)     # one-time cast/pad, not per forward call

    out = simple_nn_forward(x, prepped)
    out = jax.block_until_ready(out)
    assert out.shape == (2, 10)

    # Bit-for-recipe reference (bf16 operands, f32 accumulation) -> tight tolerance.
    ref_bf16 = reference_forward_bf16(x, params)
    assert jnp.allclose(out, ref_bf16, atol=2e-3, rtol=2e-3)

    # Full-f32 reference -> loose tolerance (bf16 quantization of inputs/weights).
    ref_f32 = reference_forward_f32(x, params)
    assert jnp.allclose(out, ref_f32, atol=3e-2, rtol=3e-2)

    print("KERNEL_OK")
</pallas_src>

<mosaic_0001>
module attributes {stable_mosaic.version = 11 : i64} {
  func.func @mlp_kernel(%arg0: i32, %arg1: memref<8x784xf32, #tpu.memory_space<vmem>>, %arg2: memref<784x256xbf16, #tpu.memory_space<vmem>>, %arg3: memref<1x256xf32, #tpu.memory_space<vmem>>, %arg4: memref<256x128xbf16, #tpu.memory_space<vmem>>, %arg5: memref<1x128xf32, #tpu.memory_space<vmem>>, %arg6: memref<128x64xbf16, #tpu.memory_space<vmem>>, %arg7: memref<1x64xf32, #tpu.memory_space<vmem>>, %arg8: memref<64x128xbf16, #tpu.memory_space<vmem>>, %arg9: memref<1x128xf32, #tpu.memory_space<vmem>>, %arg10: memref<8x128xf32, #tpu.memory_space<vmem>>) attributes {dimension_semantics = [#tpu.dimension_semantics<parallel>], iteration_bounds = array<i64: 1>, scalar_prefetch = 0 : i64, scratch_operands = 0 : i64, tpu.core_type = #tpu.core_type<tc>, window_params = [{transform_indices = @transform_0, window_bounds = array<i64: 8, 784>}, {pipeline_mode = #tpu.pipeline_mode<synchronous>, transform_indices = @transform_1, window_bounds = array<i64: 784, 256>}, {pipeline_mode = #tpu.pipeline_mode<synchronous>, transform_indices = @transform_2, window_bounds = array<i64: 1, 256>}, {pipeline_mode = #tpu.pipeline_mode<synchronous>, transform_indices = @transform_3, window_bounds = array<i64: 256, 128>}, {pipeline_mode = #tpu.pipeline_mode<synchronous>, transform_indices = @transform_4, window_bounds = array<i64: 1, 128>}, {pipeline_mode = #tpu.pipeline_mode<synchronous>, transform_indices = @transform_5, window_bounds = array<i64: 128, 64>}, {pipeline_mode = #tpu.pipeline_mode<synchronous>, transform_indices = @transform_6, window_bounds = array<i64: 1, 64>}, {pipeline_mode = #tpu.pipeline_mode<synchronous>, transform_indices = @transform_7, window_bounds = array<i64: 64, 128>}, {pipeline_mode = #tpu.pipeline_mode<synchronous>, transform_indices = @transform_8, window_bounds = array<i64: 1, 128>}, {transform_indices = @transform_9, window_bounds = array<i64: 8, 128>}]} {
    %c0 = arith.constant 0 : index
    %c0_0 = arith.constant 0 : index
    %0 = vector.load %arg1[%c0, %c0_0] : memref<8x784xf32, #tpu.memory_space<vmem>>, vector<8x784xf32>
    %1 = arith.truncf %0 : vector<8x784xf32> to vector<8x784xbf16>
    %c0_1 = arith.constant 0 : index
    %c0_2 = arith.constant 0 : index
    %2 = vector.load %arg2[%c0_1, %c0_2] : memref<784x256xbf16, #tpu.memory_space<vmem>>, vector<784x256xbf16>
    %cst = arith.constant dense<0.000000e+00> : vector<8x256xf32>
    %3 = tpu.matmul %1, %2, %cst {dimension_numbers = #tpu.dot_dimension_numbers<[1], [0], [0], [1], [0, 0, 1, 1], [], []>} : vector<8x784xbf16>, vector<784x256xbf16>, vector<8x256xf32> -> vector<8x256xf32>
    %c0_3 = arith.constant 0 : index
    %c0_4 = arith.constant 0 : index
    %4 = vector.load %arg3[%c0_3, %c0_4] : memref<1x256xf32, #tpu.memory_space<vmem>>, vector<1x256xf32>
    %5 = vector.broadcast %4 : vector<1x256xf32> to vector<8x256xf32>
    %6 = arith.addf %3, %5 : vector<8x256xf32>
    %cst_5 = arith.constant 0.000000e+00 : f32
    %7 = vector.broadcast %cst_5 : f32 to vector<8x256xf32>
    %8 = arith.maximumf %6, %7 : vector<8x256xf32>
    %9 = arith.truncf %8 : vector<8x256xf32> to vector<8x256xbf16>
    %c0_6 = arith.constant 0 : index
    %c0_7 = arith.constant 0 : index
    %10 = vector.load %arg4[%c0_6, %c0_7] : memref<256x128xbf16, #tpu.memory_space<vmem>>, vector<256x128xbf16>
    %cst_8 = arith.constant dense<0.000000e+00> : vector<8x128xf32>
    %11 = tpu.matmul %9, %10, %cst_8 {dimension_numbers = #tpu.dot_dimension_numbers<[1], [0], [0], [1], [0, 0, 1, 1], [], []>} : vector<8x256xbf16>, vector<256x128xbf16>, vector<8x128xf32> -> vector<8x128xf32>
    %c0_9 = arith.constant 0 : index
    %c0_10 = arith.constant 0 : index
    %12 = vector.load %arg5[%c0_9, %c0_10] : memref<1x128xf32, #tpu.memory_space<vmem>>, vector<1x128xf32>
    %13 = vector.broadcast %12 : vector<1x128xf32> to vector<8x128xf32>
    %14 = arith.addf %11, %13 : vector<8x128xf32>
    %cst_11 = arith.constant 0.000000e+00 : f32
    %15 = vector.broadcast %cst_11 : f32 to vector<8x128xf32>
    %16 = arith.maximumf %14, %15 : vector<8x128xf32>
    %17 = arith.truncf %16 : vector<8x128xf32> to vector<8x128xbf16>
    %c0_12 = arith.constant 0 : index
    %c0_13 = arith.constant 0 : index
    %18 = vector.load %arg6[%c0_12, %c0_13] : memref<128x64xbf16, #tpu.memory_space<vmem>>, vector<128x64xbf16>
    %cst_14 = arith.constant dense<0.000000e+00> : vector<8x64xf32>
    %19 = tpu.matmul %17, %18, %cst_14 {dimension_numbers = #tpu.dot_dimension_numbers<[1], [0], [0], [1], [0, 0, 1, 1], [], []>} : vector<8x128xbf16>, vector<128x64xbf16>, vector<8x64xf32> -> vector<8x64xf32>
    %c0_15 = arith.constant 0 : index
    %c0_16 = arith.constant 0 : index
    %20 = vector.load %arg7[%c0_15, %c0_16] : memref<1x64xf32, #tpu.memory_space<vmem>>, vector<1x64xf32>
    %21 = vector.broadcast %20 : vector<1x64xf32> to vector<8x64xf32>
    %22 = arith.addf %19, %21 : vector<8x64xf32>
    %cst_17 = arith.constant 0.000000e+00 : f32
    %23 = vector.broadcast %cst_17 : f32 to vector<8x64xf32>
    %24 = arith.maximumf %22, %23 : vector<8x64xf32>
    %25 = arith.truncf %24 : vector<8x64xf32> to vector<8x64xbf16>
    %c0_18 = arith.constant 0 : index
    %c0_19 = arith.constant 0 : index
    %26 = vector.load %arg8[%c0_18, %c0_19] : memref<64x128xbf16, #tpu.memory_space<vmem>>, vector<64x128xbf16>
    %cst_20 = arith.constant dense<0.000000e+00> : vector<8x128xf32>
    %27 = tpu.matmul %25, %26, %cst_20 {dimension_numbers = #tpu.dot_dimension_numbers<[1], [0], [0], [1], [0, 0, 1, 1], [], []>} : vector<8x64xbf16>, vector<64x128xbf16>, vector<8x128xf32> -> vector<8x128xf32>
    %c0_21 = arith.constant 0 : index
    %c0_22 = arith.constant 0 : index
    %28 = vector.load %arg9[%c0_21, %c0_22] : memref<1x128xf32, #tpu.memory_space<vmem>>, vector<1x128xf32>
    %29 = vector.broadcast %28 : vector<1x128xf32> to vector<8x128xf32>
    %30 = arith.addf %27, %29 : vector<8x128xf32>
    %c0_23 = arith.constant 0 : index
    %c0_24 = arith.constant 0 : index
    %31 = vector.load %arg10[%c0_23, %c0_24] : memref<8x128xf32, #tpu.memory_space<vmem>>, vector<8x128xf32>
    tpu.vector_store %arg10[%c0_23, %c0_24], %30 {strides = array<i32>} : memref<8x128xf32, #tpu.memory_space<vmem>>, vector<8x128xf32>,
    return
  }
  func.func @transform_0(%arg0: i32) -> (i32, i32) {
    %c0_i32 = arith.constant 0 : i32
    %c0_i32_0 = arith.constant 0 : i32
    return %arg0, %c0_i32 : i32, i32
  }
  func.func @transform_1(%arg0: i32) -> (i32, i32) {
    %c0_i32 = arith.constant 0 : i32
    %c0_i32_0 = arith.constant 0 : i32
    %c0_i32_1 = arith.constant 0 : i32
    return %c0_i32, %c0_i32_0 : i32, i32
  }
  func.func @transform_2(%arg0: i32) -> (i32, i32) {
    %c0_i32 = arith.constant 0 : i32
    %c0_i32_0 = arith.constant 0 : i32
    %c0_i32_1 = arith.constant 0 : i32
    return %c0_i32, %c0_i32_0 : i32, i32
  }
  func.func @transform_3(%arg0: i32) -> (i32, i32) {
    %c0_i32 = arith.constant 0 : i32
    %c0_i32_0 = arith.constant 0 : i32
    %c0_i32_1 = arith.constant 0 : i32
    return %c0_i32, %c0_i32_0 : i32, i32
  }
  func.func @transform_4(%arg0: i32) -> (i32, i32) {
    %c0_i32 = arith.constant 0 : i32
    %c0_i32_0 = arith.constant 0 : i32
    %c0_i32_1 = arith.constant 0 : i32
    return %c0_i32, %c0_i32_0 : i32, i32
  }
  func.func @transform_5(%arg0: i32) -> (i32, i32) {
    %c0_i32 = arith.constant 0 : i32
    %c0_i32_0 = arith.constant 0 : i32
    %c0_i32_1 = arith.constant 0 : i32
    return %c0_i32, %c0_i32_0 : i32, i32
  }
  func.func @transform_6(%arg0: i32) -> (i32, i32) {
    %c0_i32 = arith.constant 0 : i32
    %c0_i32_0 = arith.constant 0 : i32
    %c0_i32_1 = arith.constant 0 : i32
    return %c0_i32, %c0_i32_0 : i32, i32
  }
  func.func @transform_7(%arg0: i32) -> (i32, i32) {
    %c0_i32 = arith.constant 0 : i32
    %c0_i32_0 = arith.constant 0 : i32
    %c0_i32_1 = arith.constant 0 : i32
    return %c0_i32, %c0_i32_0 : i32, i32
  }
  func.func @transform_8(%arg0: i32) -> (i32, i32) {
    %c0_i32 = arith.constant 0 : i32
    %c0_i32_0 = arith.constant 0 : i32
    %c0_i32_1 = arith.constant 0 : i32
    return %c0_i32, %c0_i32_0 : i32, i32
  }
  func.func @transform_9(%arg0: i32) -> (i32, i32) {
    %c0_i32 = arith.constant 0 : i32
    %c0_i32_0 = arith.constant 0 : i32
    return %arg0, %c0_i32 : i32, i32
  }
}

</mosaic_0001>

<bundles_post_ra>
// kernel: simple_nn_forward.1
= control target key start
LH: loop header
LB: loop body
LE: loop exit
PB: predicated region body
PF: predicated region fallthrough
CT: control target
= control target key end

     0   :  { %14 = vsyncpa [#allocation3], 0  ;;  %s1614_s30 = smov [#allocation2]   ;;  %s1808_s0 = inlined_call_operand.vmem [shape: f32[8,784], index: 0, kind: input, shape index: {}]   ;;  %s1809_s1 = inlined_call_operand.hbm [shape: bf16[784,256], index: 1, kind: input, shape index: {}]   ;;  %s1810_s2 = inlined_call_operand.vmem [shape: f32[1,256], index: 2, kind: input, shape index: {}]   ;;  %s1811_s3 = inlined_call_operand.vmem [shape: bf16[256,128], index: 3, kind: input, shape index: {}]   ;;  %s1812_s4 = inlined_call_operand.vmem [shape: f32[1,128], index: 4, kind: input, shape index: {}]   ;;  %s1813_s5 = inlined_call_operand.vmem [shape: bf16[128,64], index: 5, kind: input, shape index: {}]   ;;  %s1814_s6 = inlined_call_operand.vmem [shape: f32[1,64], index: 6, kind: input, shape index: {}]   ;;  %s1815_s7 = inlined_call_operand.vmem [shape: bf16[64,128], index: 7, kind: input, shape index: {}]   ;;  %s1816_s8 = inlined_call_operand.vmem [shape: f32[1,128], index: 8, kind: input, shape index: {}]   ;;  %s1817_s9 = inlined_call_operand.vmem [shape: f32[8,128], index: 9, kind: output, shape index: {}]  }
   0x1   :  { %s22_s10 = sshll.u32 %s1614_s30, 4  ;;  %s23_s10 = int_to_ptr.vmem [resolvable:$true] %s22_s10 }
   0x2   :  { %s1600_s11 = scalar_lea.vmem %s23_s10, 12544  ;;  %p1605_p1 = scmp.lt.s32.totalorder %s23_s10, %s23_s10 }
   0x3   :  { %p1601_p0 = scmp.ne.s32.totalorder %s23_s10, %s1600_s11  ;;  %p1606_p2 = scmp.lt.s32.totalorder %s1600_s11, %s1600_s11 }
   0x5   :  { %p1607_p3 = por %p1606_p2, %p1605_p1 }
   0x7   :  { %p1608_p4 = pnand %p1607_p3, %p1601_p0 }
   0x9   :  { %1611 = shalt.err (!%p1608_p4)
}
   0xa   :  { %s1615_s12 = smov 128   ;;  %s1616_s13 = smov 8  }
   0xb   :  { %28 = dma.hbm_to_vmem [thread:$0]  %s1809_s1, 12544, %s23_s10, [#allocation3], %s1615_s12, %s1615_s12, %s1616_s13  }
   0xc   :  { %1612 = dma.done.wait [#allocation3], 12544  }
   0xd   :  { %1613 = vsyncadd [#allocation3], 4294954752  ;;  %v1417_v0 = vld [vmem:[#allocation2 + $0x74] ss:$8 sps:$4 sm:$0xff]   ;;  %v1419_v1 = vld [vmem:[#allocation2 + $0x70] ss:$8 sps:$4 sm:$0xff]  }
   0xe   :  { %665 = vmatprep.subr.bf16.mxu0 %v1417_v0  ;;  %v1420_v2 = vld [vmem:[#allocation2 + $0x174] ss:$8 sps:$4 sm:$0xff]   ;;  %v1422_v3 = vld [vmem:[#allocation2 + $0x170] ss:$8 sps:$4 sm:$0xff]   ;;  %v1423_v4 = vld [vmem:[#allocation2 + $0x64] ss:$8 sps:$4 sm:$0xff]  }
   0xf   :  { %666 = vmatpush1.bf16.msra.mxu0 %v1419_v1  ;;  %v1425_v5 = vld [vmem:[#allocation2 + $0x60] ss:$8 sps:$4 sm:$0xff]   ;;  %706 = vmatprep.subr.bf16.mxu1 %v1420_v2  ;;  %v1426_v6 = vld [vmem:[#allocation2 + $0x164] ss:$8 sps:$4 sm:$0xff]   ;;  %v1429_v8 = vld [vmem:[#allocation2 + $0x54] ss:$8 sps:$4 sm:$0xff]  }
  0x10   :  { %707 = vmatpush1.bf16.msra.mxu1 %v1422_v3  ;;  %667 = vmatprep.subr.bf16.mxu0 %v1423_v4  ;;  %v1428_v7 = vld [vmem:[#allocation2 + $0x160] ss:$8 sps:$4 sm:$0xff]   ;;  %v1431_v9 = vld [vmem:[#allocation2 + $0x50] ss:$8 sps:$4 sm:$0xff]   ;;  %v1432_v10 = vld [vmem:[#allocation2 + $0x154] ss:$8 sps:$4 sm:$0xff]  }
  0x11   :  { %708 = vmatprep.subr.bf16.mxu1 %v1426_v6  ;;  %v1435_v11 = vld [vmem:[#allocation2 + $0x44] ss:$8 sps:$4 sm:$0xff]   ;;  %v1434_v12 = vld [vmem:[#allocation2 + $0x150] ss:$8 sps:$4 sm:$0xff]   ;;  %v1437_v14 = vld [vmem:[#allocation2 + $0x40] ss:$8 sps:$4 sm:$0xff]  }
  0x12   :  { %v1438_v13 = vld [vmem:[#allocation2 + $0x144] ss:$8 sps:$4 sm:$0xff]   ;;  %v1441_v15 = vld [vmem:[#allocation2 + $0x34] ss:$8 sps:$4 sm:$0xff]   ;;  %v1440_v16 = vld [vmem:[#allocation2 + $0x140] ss:$8 sps:$4 sm:$0xff]  }
  0x13   :  { %668 = vmatpush1.bf16.msra.mxu0 %v1425_v5  ;;  %v1444_v17 = vld [vmem:[#allocation2 + $0x134] ss:$8 sps:$4 sm:$0xff]   ;;  %v1443_v18 = vld [vmem:[#allocation2 + $0x30] ss:$8 sps:$4 sm:$0xff]   ;;  %v1447_v19 = vld [vmem:[#allocation2 + $0x24] ss:$8 sps:$4 sm:$0xff]  }
  0x14   :  { %669 = vmatprep.subr.bf16.mxu0 %v1429_v8  ;;  %709 = vmatpush1.bf16.msra.mxu1 %v1428_v7  ;;  %v1446_v20 = vld [vmem:[#allocation2 + $0x130] ss:$8 sps:$4 sm:$0xff]   ;;  %v1450_v21 = vld [vmem:[#allocation2 + $0x124] ss:$8 sps:$4 sm:$0xff]   ;;  %v1449_v22 = vld [vmem:[#allocation2 + $0x20] ss:$8 sps:$4 sm:$0xff]  }
  0x15   :  { %710 = vmatprep.subr.bf16.mxu1 %v1432_v10  ;;  %v1453_v23 = vld [vmem:[#allocation2 + $0x14] ss:$8 sps:$4 sm:$0xff]   ;;  %v1452_v24 = vld [vmem:[#allocation2 + $0x120] ss:$8 sps:$4 sm:$0xff]   ;;  %v1455_v26 = vld [vmem:[#allocation2 + $0x10] ss:$8 sps:$4 sm:$0xff]  }
  0x16   :  { %v1456_v25 = vld [vmem:[#allocation2 + $0x114] ss:$8 sps:$4 sm:$0xff]   ;;  %v1459_v27 = vld [vmem:[#allocation2 + $0x4] ss:$8 sps:$4 sm:$0xff]   ;;  %v1458_v28 = vld [vmem:[#allocation2 + $0x110] ss:$8 sps:$4 sm:$0xff]  }
  0x17   :  { %670 = vmatpush1.bf16.msra.mxu0 %v1431_v9  ;;  %v1462_v29 = vld [vmem:[#allocation2 + $0x104] ss:$8 sps:$4 sm:$0xff]   ;;  %v1461_v30 = vld [vmem:[#allocation2] ss:$8 sps:$4 sm:$0xff]   ;;  %v1465_v31 = vld [vmem:[#allocation2 + $0xf4] ss:$8 sps:$4 sm:$0xff]  }
  0x18   :  { %671 = vmatprep.subr.bf16.mxu0 %v1435_v11  ;;  %711 = vmatpush1.bf16.msra.mxu1 %v1434_v12  ;;  %v1464_v32 = vld [vmem:[#allocation2 + $0x100] ss:$8 sps:$4 sm:$0xff]   ;;  %v1468_v33 = vld [vmem:[#allocation2 + $0x1f4] ss:$8 sps:$4 sm:$0xff]   ;;  %v1467_v34 = vld [vmem:[#allocation2 + $0xf0] ss:$8 sps:$4 sm:$0xff]  }
  0x19   :  { %712 = vmatprep.subr.bf16.mxu1 %v1438_v13  ;;  %v1471_v35 = vld [vmem:[#allocation2 + $0xe4] ss:$8 sps:$4 sm:$0xff]   ;;  %v1470_v36 = vld [vmem:[#allocation2 + $0x1f0] ss:$8 sps:$4 sm:$0xff]   ;;  %v1473_v38 = vld [vmem:[#allocation2 + $0xe0] ss:$8 sps:$4 sm:$0xff]  }
  0x1a   :  { %v1474_v37 = vld [vmem:[#allocation2 + $0x1e4] ss:$8 sps:$4 sm:$0xff]   ;;  %v1477_v39 = vld [vmem:[#allocation2 + $0xd4] ss:$8 sps:$4 sm:$0xff]   ;;  %v1476_v40 = vld [vmem:[#allocation2 + $0x1e0] ss:$8 sps:$4 sm:$0xff]  }
  0x1b   :  { %672 = vmatpush1.bf16.msra.mxu0 %v1437_v14  ;;  %v1480_v41 = vld [vmem:[#allocation2 + $0x1d4] ss:$8 sps:$4 sm:$0xff]   ;;  %v1479_v42 = vld [vmem:[#allocation2 + $0xd0] ss:$8 sps:$4 sm:$0xff]   ;;  %v1483_v43 = vld [vmem:[#allocation2 + $0xc4] ss:$8 sps:$4 sm:$0xff]  }
  0x1c   :  { %673 = vmatprep.subr.bf16.mxu0 %v1441_v15  ;;  %713 = vmatpush1.bf16.msra.mxu1 %v1440_v16  ;;  %v1482_v44 = vld [vmem:[#allocation2 + $0x1d0] ss:$8 sps:$4 sm:$0xff]   ;;  %v1486_v45 = vld [vmem:[#allocation2 + $0x1c4] ss:$8 sps:$4 sm:$0xff]   ;;  %v1485_v47 = vld [vmem:[#allocation2 + $0xc0] ss:$8 sps:$4 sm:$0xff]  }
  0x1d   :  { %714 = vmatprep.subr.bf16.mxu1 %v1444_v17  ;;  %v48_v46 = vld [vmem:[%s1808_s0 + $0x8] sm:$0xff]  ;;  %v1489_v49 = vld [vmem:[#allocation2 + $0xb4] ss:$8 sps:$4 sm:$0xff]   ;;  %v1491_v54 = vld [vmem:[#allocation2 + $0xb0] ss:$8 sps:$4 sm:$0xff]   ;;  %vm661_vm0 = vcmask 130048  }
  0x1e   :  { %v55_v48 = vpack.c.bf16 %v48_v46, %v48_v46  ;;  %v50_v50 = vld [vmem:[%s1808_s0 + $0x18] sm:$0xff]  ;;  %v1488_v51 = vld [vmem:[#allocation2 + $0x1c0] ss:$8 sps:$4 sm:$0xff]   ;;  %v1495_v55 = vld [vmem:[#allocation2 + $0xa4] ss:$8 sps:$4 sm:$0xff]   ;;  %vm1619_vm1 = vmmov 0  }
  0x1f   :  { %674 = vmatpush1.bf16.msra.mxu0 %v1443_v18  ;;  %v57_v52 = vpack.c.bf16 %v50_v50, %v50_v50  ;;  %v1492_v53 = vld [vmem:[#allocation2 + $0x1b4] ss:$8 sps:$4 sm:$0xff]   ;;  %v1494_v56 = vld [vmem:[#allocation2 + $0x1b0] ss:$8 sps:$4 sm:$0xff]   ;;  %v1498_v57 = vld [vmem:[#allocation2 + $0x1a4] ss:$8 sps:$4 sm:$0xff]  }
  0x20   :  { %675 = vmatprep.subr.bf16.mxu0 %v1447_v19  ;;  %715 = vmatpush1.bf16.msra.mxu1 %v1446_v20  ;;  %v1497_v58 = vld [vmem:[#allocation2 + $0xa0] ss:$8 sps:$4 sm:$0xff]   ;;  %v1501_v59 = vld [vmem:[#allocation2 + $0x94] ss:$8 sps:$4 sm:$0xff]   ;;  %v1503_v62 = vld [vmem:[#allocation2 + $0x90] ss:$8 sps:$4 sm:$0xff]  }
  0x21   :  { %716 = vmatprep.subr.bf16.mxu1 %v1450_v21  ;;  %697 = vmatprep.mubr.bf16.mxu0 %v55_v48  ;;  %v1500_v60 = vld [vmem:[#allocation2 + $0x1a0] ss:$8 sps:$4 sm:$0xff]   ;;  %v1504_v61 = vld [vmem:[#allocation2 + $0x194] ss:$8 sps:$4 sm:$0xff]   ;;  %v1507_v63 = vld [vmem:[#allocation2 + $0x84] ss:$8 sps:$4 sm:$0xff]  }
  0x22   :  { %738 = vmatprep.mubr.bf16.mxu1 %v57_v52  ;;  %v1506_v0 = vld [vmem:[#allocation2 + $0x190] ss:$8 sps:$4 sm:$0xff]   ;;  %v1509_v1 = vld [vmem:[#allocation2 + $0x80] ss:$8 sps:$4 sm:$0xff]   ;;  %v1510_v2 = vld [vmem:[#allocation2 + $0x184] ss:$8 sps:$4 sm:$0xff]  }
  0x23   :  { %676 = vmatpush1.bf16.msra.mxu0 %v1449_v22  ;;  %v1512_v3 = vld [vmem:[#allocation2 + $0x180] ss:$8 sps:$4 sm:$0xff]   ;;  %v1515_v5 = vld [vmem:[#allocation2 + $0x274] ss:$8 sps:$4 sm:$0xff]   ;;  %v1513_v8 = vld [vmem:[#allocation2 + $0x270] ss:$8 sps:$4 sm:$0xff]  }
  0x24   :  { %677 = vmatprep.subr.bf16.mxu0 %v1453_v23  ;;  %717 = vmatpush1.bf16.msra.mxu1 %v1452_v24  ;;  %v47_v4 = vld [vmem:[%s1808_s0] sm:$0xff]  ;;  %v49_v6 = vld [vmem:[%s1808_s0 + $0x10] sm:$0xff]  ;;  %v52_v16 = vld [vmem:[%s1808_s0 + $0x28] sm:$0xff]  ;;  %v1617_v19 = vmov 0   ;;  %vm1162_vm2 = vcmask 523264  }
  0x25   :  { %718 = vmatprep.subr.bf16.mxu1 %v1456_v25  ;;  %v54_v7 = vpack.c.bf16 %v47_v4, %v47_v4  ;;  %v1518_v9 = vld [vmem:[#allocation2 + $0x264] ss:$8 sps:$4 sm:$0xff]   ;;  %v56_v10 = vpack.c.bf16 %v49_v6, %v49_v6  ;;  %v1558_v11 = vld [vmem:[#allocation2 + $0x300] ss:$8 sps:$4 sm:$0xff]   ;;  %v1521_v14 = vld [vmem:[#allocation2 + $0x254] ss:$8 sps:$4 sm:$0xff]   ;;  %v59_v17 = vpack.c.bf16 %v52_v16, %v52_v16 }
  0x26   :  { %v1560_v12 = vld [vmem:[#allocation2 + $0x304] ss:$8 sps:$4 sm:$0xff]   ;;  %v1516_v13 = vld [vmem:[#allocation2 + $0x260] ss:$8 sps:$4 sm:$0xff]   ;;  %v53_v15 = vld [vmem:[%s1808_s0 + $0x30] sm:$0xff] }
  0x27   :  { %678 = vmatpush1.bf16.msra.mxu0 %v1455_v26  ;;  %v1519_v18 = vld [vmem:[#allocation2 + $0x250] ss:$8 sps:$4 sm:$0xff]   ;;  %v1524_v20 = vld [vmem:[#allocation2 + $0x244] ss:$8 sps:$4 sm:$0xff]   ;;  %v60_v21 = vpack.c.bf16 %v53_v15, %v53_v15  ;;  %v1522_v22 = vld [vmem:[#allocation2 + $0x240] ss:$8 sps:$4 sm:$0xff]  }
  0x28   :  { %679 = vmatprep.subr.bf16.mxu0 %v1459_v27  ;;  %719 = vmatpush1.bf16.msra.mxu1 %v1458_v28  ;;  %v1527_v23 = vld [vmem:[#allocation2 + $0x234] ss:$8 sps:$4 sm:$0xff]   ;;  %v1525_v24 = vld [vmem:[#allocation2 + $0x230] ss:$8 sps:$4 sm:$0xff]   ;;  %v1530_v25 = vld [vmem:[#allocation2 + $0x224] ss:$8 sps:$4 sm:$0xff]  }
  0x29   :  { %720 = vmatprep.subr.bf16.mxu1 %v1462_v29  ;;  %v1528_v26 = vld [vmem:[#allocation2 + $0x220] ss:$8 sps:$4 sm:$0xff]   ;;  %v1533_v27 = vld [vmem:[#allocation2 + $0x214] ss:$8 sps:$4 sm:$0xff]   ;;  %v1531_v28 = vld [vmem:[#allocation2 + $0x210] ss:$8 sps:$4 sm:$0xff]  }
  0x2a   :  { %v1536_v29 = vld [vmem:[#allocation2 + $0x204] ss:$8 sps:$4 sm:$0xff]   ;;  %v1561_v46 = vld [vmem:[#allocation2 + $0x280] ss:$8 sps:$4 sm:$0xff]   ;;  %v1565_v50 = vld [vmem:[%s1811_s3 + $0x38] sm:$0xff]  }
  0x2b   :  { %680 = vmatpush1.bf16.msra.mxu0 %v1461_v30  ;;  %v1534_v30 = vld [vmem:[#allocation2 + $0x200] ss:$8 sps:$4 sm:$0xff]   ;;  %v1567_v52 = vld [vmem:[%s1811_s3 + $0x30] sm:$0xff]  }
  0x2c   :  { %681 = vmatprep.subr.bf16.mxu0 %v1465_v31  ;;  %721 = vmatpush1.bf16.msra.mxu1 %v1464_v32  ;;  %v1539_v31 = vld [vmem:[#allocation2 + $0x2f4] ss:$8 sps:$4 sm:$0xff]   ;;  %v1537_v32 = vld [vmem:[#allocation2 + $0x2f0] ss:$8 sps:$4 sm:$0xff]  }
  0x2d   :  { %722 = vmatprep.subr.bf16.mxu1 %v1468_v33  ;;  %v1542_v33 = vld [vmem:[#allocation2 + $0x2e4] ss:$8 sps:$4 sm:$0xff]  }
  0x2f   :  { %682 = vmatpush2.bf16.msra.mxu0 %v1467_v34  ;;  %v1540_v34 = vld [vmem:[#allocation2 + $0x2e0] ss:$8 sps:$4 sm:$0xff]  }
  0x30   :  { %683 = vmatprep.subr.bf16.mxu0 %v1471_v35  ;;  %723 = vmatpush2.bf16.msra.mxu1 %v1470_v36  ;;  %v1545_v35 = vld [vmem:[#allocation2 + $0x2d4] ss:$8 sps:$4 sm:$0xff]   ;;  %v1543_v36 = vld [vmem:[#allocation2 + $0x2d0] ss:$8 sps:$4 sm:$0xff]  }
  0x31   :  { %724 = vmatprep.subr.bf16.mxu1 %v1474_v37  ;;  %v1548_v37 = vld [vmem:[#allocation2 + $0x2c4] ss:$8 sps:$4 sm:$0xff]  }
  0x33   :  { %684 = vmatpush2.bf16.msra.mxu0 %v1473_v38  ;;  %v1546_v38 = vld [vmem:[#allocation2 + $0x2c0] ss:$8 sps:$4 sm:$0xff]  }
  0x34   :  { %685 = vmatprep.subr.bf16.mxu0 %v1477_v39  ;;  %725 = vmatpush2.bf16.msra.mxu1 %v1476_v40  ;;  %v1551_v39 = vld [vmem:[#allocation2 + $0x2b4] ss:$8 sps:$4 sm:$0xff]   ;;  %v1549_v40 = vld [vmem:[#allocation2 + $0x2b0] ss:$8 sps:$4 sm:$0xff]  }
  0x35   :  { %726 = vmatprep.subr.bf16.mxu1 %v1480_v41  ;;  %v1554_v41 = vld [vmem:[#allocation2 + $0x2a4] ss:$8 sps:$4 sm:$0xff]  }
  0x37   :  { %686 = vmatpush2.bf16.msra.mxu0 %v1479_v42  ;;  %v1552_v42 = vld [vmem:[#allocation2 + $0x2a0] ss:$8 sps:$4 sm:$0xff]  }
  0x38   :  { %687 = vmatprep.subr.bf16.mxu0 %v1483_v43  ;;  %727 = vmatpush2.bf16.msra.mxu1 %v1482_v44  ;;  %v1557_v43 = vld [vmem:[#allocation2 + $0x294] ss:$8 sps:$4 sm:$0xff]   ;;  %v1555_v44 = vld [vmem:[#allocation2 + $0x290] ss:$8 sps:$4 sm:$0xff]  }
  0x39   :  { %728 = vmatprep.subr.bf16.mxu1 %v1486_v45  ;;  %v1563_v45 = vld [vmem:[#allocation2 + $0x284] ss:$8 sps:$4 sm:$0xff]  }
  0x3b   :  { %688 = vmatpush2.bf16.msra.mxu0 %v1485_v47  ;;  %v51_v47 = vld [vmem:[%s1808_s0 + $0x20] sm:$0xff] }
  0x3c   :  { %689 = vmatprep.subr.bf16.mxu0 %v1489_v49  ;;  %729 = vmatpush2.bf16.msra.mxu1 %v1488_v51  ;;  %v58_v48 = vpack.c.bf16 %v51_v47, %v51_v47  ;;  %v1564_v49 = vld [vmem:[%s1811_s3 + $0x78] sm:$0xff]   ;;  %v1566_v51 = vld [vmem:[%s1811_s3 + $0x70] sm:$0xff]  }
  0x3d   :  { %730 = vmatprep.subr.bf16.mxu1 %v1492_v53  ;;  %v1568_v53 = vld [vmem:[%s1811_s3 + $0x68] sm:$0xff]  }
  0x3f   :  { %690 = vmatpush2.bf16.msra.mxu0 %v1491_v54  ;;  %v1569_v54 = vld [vmem:[%s1811_s3 + $0x28] sm:$0xff]  }
  0x40   :  { %691 = vmatprep.subr.bf16.mxu0 %v1495_v55  ;;  %731 = vmatpush2.bf16.msra.mxu1 %v1494_v56  ;;  %v1570_v55 = vld [vmem:[%s1811_s3 + $0x60] sm:$0xff]  }
  0x41   :  { %732 = vmatprep.subr.bf16.mxu1 %v1498_v57  ;;  %v1571_v56 = vld [vmem:[%s1811_s3 + $0x20] sm:$0xff]   ;;  %v1572_v57 = vld [vmem:[%s1811_s3 + $0x58] sm:$0xff]  }
  0x43   :  { %692 = vmatpush2.bf16.msra.mxu0 %v1497_v58  ;;  %v1573_v58 = vld [vmem:[%s1811_s3 + $0x18] sm:$0xff]  }
  0x44   :  { %693 = vmatprep.subr.bf16.mxu0 %v1501_v59  ;;  %733 = vmatpush2.bf16.msra.mxu1 %v1500_v60  ;;  %v1574_v59 = vld [vmem:[%s1811_s3 + $0x50] sm:$0xff]  }
  0x45   :  { %734 = vmatprep.subr.bf16.mxu1 %v1504_v61  ;;  %v1575_v60 = vld [vmem:[%s1811_s3 + $0x10] sm:$0xff]   ;;  %v1576_v61 = vld [vmem:[%s1811_s3 + $0x48] sm:$0xff]  }
  0x47   :  { %694 = vmatpush2.bf16.msra.mxu0 %v1503_v62  ;;  %v1577_v62 = vld [vmem:[%s1811_s3 + $0x8] sm:$0xff]  }
  0x48   :  { %695 = vmatprep.subr.bf16.mxu0 %v1507_v63  ;;  %735 = vmatpush2.bf16.msra.mxu1 %v1506_v0  ;;  %v1578_v63 = vld [vmem:[%s1811_s3 + $0x40] sm:$0xff]  }
  0x49   :  { %736 = vmatprep.subr.bf16.mxu1 %v1510_v2  ;;  %v1579_v0 = vld [vmem:[%s1811_s3] sm:$0xff]  }
  0x4b   :  { %696 = vmatpush2.bf16.msra.mxu0 %v1509_v1  ;;  %v1618_v1 = vmov 0.0  }
  0x4c   :  { %747 = vmatprep.subr.bf16.mxu0 %v1515_v5  ;;  %737 = vmatpush2.bf16.msra.mxu1 %v1512_v3 }
  0x4d   :  { %802 = vmatprep.subr.bf16.mxu1 %v1560_v12 }
  0x4e   :  { %698 = vmatmul.mubr.bf16.vlgmr.msra.gmra.mxu0 %v54_v7 }
  0x4f   :  { %748 = vmatpush1.bf16.msra.mxu0 %v1513_v8  ;;  %739 = vmatmul.mubr.bf16.vlgmr.msra.gmra.mxu1 %v56_v10 }
  0x50   :  { %749 = vmatprep.subr.bf16.mxu0 %v1518_v9  ;;  %803 = vmatpush1.bf16.msra.mxu1 %v1558_v11 }
  0x51   :  { %820 = vmatprep.mubr.bf16.mxu1 %v1617_v19  ;;  %779 = vmatprep.mubr.bf16.mxu0 %v59_v17  ;;  %v159_v17 = vld [vmem:[%s1810_s2] sm:$0x3] }
  0x52   :  { %1343 = vmatprep.subr.bf16.mxu1 %v1564_v49 }
  0x53   :  { %750 = vmatpush1.bf16.msra.mxu0 %v1516_v13 }
  0x54   :  { %751 = vmatprep.subr.bf16.mxu0 %v1521_v14  ;;  %v161_v14 = vlaneseq }
  0x56   :  { %v162_v15 = vshrl.u32 %v161_v14, 7 }
  0x57   :  { %752 = vmatpush1.bf16.msra.mxu0 %v1519_v18  ;;  %1310 = vmatmul.mubr.msk.bf16.vlgmr.msra.gmra.mxu1 %vm661_vm0, %v60_v21 }
  0x58   :  { %753 = vmatprep.subr.bf16.mxu0 %v1524_v20  ;;  %1344 = vmatpush3.bf16.msra.mxu1 %v1565_v50  ;;  %v163_v16 = vsub.s32 0, %v162_v15  ;;  %v167_v18 = vsub.s32 1, %v162_v15 }
  0x59   :  { %1345 = vmatprep.subr.bf16.mxu1 %v1566_v51 }
  0x5a   :  { %v164_v19 = vrot.slane %v159_v17, %v163_v16  ;;  %v168_v20 = vrot.slane %v159_v17, %v167_v18 }
  0x5b   :  { %754 = vmatpush1.bf16.msra.mxu0 %v1522_v22 }
  0x5c   :  { %755 = vmatprep.subr.bf16.mxu0 %v1527_v23  ;;  %1346 = vmatpush3.bf16.msra.mxu1 %v1567_v52 }
  0x5d   :  { %1347 = vmatprep.subr.bf16.mxu1 %v1568_v53 }
  0x5f   :  { %756 = vmatpush1.bf16.msra.mxu0 %v1525_v24 }
  0x60   :  { %757 = vmatprep.subr.bf16.mxu0 %v1530_v25  ;;  %1348 = vmatpush3.bf16.msra.mxu1 %v1569_v54 }
  0x61   :  { %1349 = vmatprep.subr.bf16.mxu1 %v1570_v55 }
  0x63   :  { %758 = vmatpush1.bf16.msra.mxu0 %v1528_v26 }
  0x64   :  { %759 = vmatprep.subr.bf16.mxu0 %v1533_v27  ;;  %1350 = vmatpush3.bf16.msra.mxu1 %v1571_v56  ;;  %v1590_v56 = vld [vmem:[%s1815_s7 + $0x8] sm:$0xff]  }
  0x65   :  { %1351 = vmatprep.subr.bf16.mxu1 %v1572_v57  ;;  %v1591_v57 = vld [vmem:[%s1815_s7] sm:$0xff]  }
  0x67   :  { %760 = vmatpush1.bf16.msra.mxu0 %v1531_v28 }
  0x68   :  { %761 = vmatprep.subr.bf16.mxu0 %v1536_v29  ;;  %1352 = vmatpush3.bf16.msra.mxu1 %v1573_v58  ;;  %v1328_v58 = vld [vmem:[%s1814_s6] ss:$0 sm:$0xff] }
  0x69   :  { %1353 = vmatprep.subr.bf16.mxu1 %v1574_v59 }
  0x6b   :  { %762 = vmatpush1.bf16.msra.mxu0 %v1534_v30 }
  0x6c   :  { %763 = vmatprep.subr.bf16.mxu0 %v1539_v31  ;;  %1354 = vmatpush3.bf16.msra.mxu1 %v1575_v60 }
  0x6d   :  { %1355 = vmatprep.subr.bf16.mxu1 %v1576_v61 }
  0x6f   :  { %764 = vmatpush2.bf16.msra.mxu0 %v1537_v32 }
  0x70   :  { %765 = vmatprep.subr.bf16.mxu0 %v1542_v33  ;;  %1356 = vmatpush3.bf16.msra.mxu1 %v1577_v62 }
  0x71   :  { %1357 = vmatprep.subr.bf16.mxu1 %v1578_v63 }
  0x73   :  { %766 = vmatpush2.bf16.msra.mxu0 %v1540_v34 }
  0x74   :  { %767 = vmatprep.subr.bf16.mxu0 %v1545_v35  ;;  %1358 = vmatpush3.bf16.msra.mxu1 %v1579_v0 }
  0x75   :  { %1379 = vmatprep.subr.bf16.mxu1 %v1618_v1 }
  0x77   :  { %768 = vmatpush2.bf16.msra.mxu0 %v1543_v36  ;;  %v1580_v36 = vld [vmem:[%s1813_s5 + $0x38] sm:$0xff]  }
  0x78   :  { %769 = vmatprep.subr.bf16.mxu0 %v1548_v37 }
  0x7b   :  { %770 = vmatpush2.bf16.msra.mxu0 %v1546_v38  ;;  %v1581_v38 = vld [vmem:[%s1813_s5 + $0x30] sm:$0xff]  }
  0x7c   :  { %771 = vmatprep.subr.bf16.mxu0 %v1551_v39  ;;  %v1582_v39 = vld [vmem:[%s1813_s5 + $0x28] sm:$0xff]  }
  0x7f   :  { %772 = vmatpush2.bf16.msra.mxu0 %v1549_v40  ;;  %v1583_v40 = vld [vmem:[%s1813_s5 + $0x20] sm:$0xff]  }
  0x80   :  { %773 = vmatprep.subr.bf16.mxu0 %v1554_v41  ;;  %v1584_v41 = vld [vmem:[%s1813_s5 + $0x18] sm:$0xff]  }
  0x83   :  { %774 = vmatpush2.bf16.msra.mxu0 %v1552_v42  ;;  %v1585_v42 = vld [vmem:[%s1813_s5 + $0x10] sm:$0xff]  }
  0x84   :  { %775 = vmatprep.subr.bf16.mxu0 %v1557_v43  ;;  %v1586_v43 = vld [vmem:[%s1813_s5 + $0x8] sm:$0xff]  }
  0x87   :  { %776 = vmatpush2.bf16.msra.mxu0 %v1555_v44  ;;  %v1587_v44 = vld [vmem:[%s1813_s5] sm:$0xff]  }
  0x88   :  { %777 = vmatprep.subr.bf16.mxu0 %v1563_v45  ;;  %v1588_v45 = vld [vmem:[%s1815_s7 + $0x18] sm:$0xff]  }
  0x8b   :  { %778 = vmatpush2.bf16.msra.mxu0 %v1561_v46  ;;  %v1589_v46 = vld [vmem:[%s1815_s7 + $0x10] sm:$0xff]  }
  0x8c   :  { %1399 = vmatprep.subr.bf16.mxu0 %v1618_v1 }
  0x8e   :  { %780 = vmatmul.mubr.bf16.vlgmr.msra.gmra.mxu0 %v58_v48  ;;  %v1311_v48 = vld [vmem:[%s1812_s4] ss:$0 sm:$0xff] }
  0x8f   :  { %1407 = vmatprep.mubr.msk.bf16.mxu0 %vm1619_vm1, %v1618_v1  ;;  %1400 = vmatpush3.bf16.msra.mxu0 %v1588_v45 }
  0x90   :  { %1401 = vmatprep.subr.bf16.mxu0 %v1618_v1 }
  0x93   :  { %1402 = vmatpush3.bf16.msra.mxu0 %v1589_v46 }
  0x94   :  { %1403 = vmatprep.subr.bf16.mxu0 %v1618_v1 }
  0x97   :  { %1404 = vmatpush3.bf16.msra.mxu0 %v1590_v56 }
  0x98   :  { %1405 = vmatprep.subr.bf16.mxu0 %v1618_v1 }
  0x9b   :  { %1406 = vmatpush3.bf16.msra.mxu0 %v1591_v57 }
 0x10e   :  { %v699_v2 = vpop.f32.mrf.mxu0 }
 0x10f   :  { %v740_v4 = vpop.f32.mrf.mxu1  ;;  %v700_v21 = vadd.f32 %v699_v2, %v164_v19 }
 0x110   :  { %v701_v3 = vpop.f32.mrf.mxu0 }
 0x111   :  { %v742_v6 = vpop.f32.mrf.mxu1  ;;  %v702_v22 = vadd.f32 %v701_v3, %v168_v20  ;;  %v741_v23 = vadd.f32 %v740_v4, %v700_v21 }
 0x112   :  { %v703_v5 = vpop.f32.mrf.mxu0 }
 0x113   :  { %v744_v8 = vpop.f32.mrf.mxu1  ;;  %v743_v25 = vadd.f32 %v742_v6, %v702_v22 }
 0x114   :  { %v704_v7 = vpop.f32.mrf.mxu0 }
 0x115   :  { %v745_v9 = vpop.f32.mrf.mxu1 }
 0x117   :  { %v822_v10 = vpop.f32.mrf.mxu1 }
 0x119   :  { %v824_v11 = vpop.f32.mrf.mxu1 }
 0x11b   :  { %v826_v12 = vpop.f32.mrf.mxu1 }
 0x11d   :  { %v827_v13 = vpop.f32.mrf.mxu1 }
 0x14e   :  { %v781_v24 = vpop.f32.mrf.mxu0 }
 0x14f   :  { %v782_v26 = vadd.f32 %v781_v24, %v741_v23 }
 0x150   :  { %v783_v27 = vpop.f32.mrf.mxu0 }
 0x151   :  { %v823_v28 = vadd.f32 %v822_v10, %v782_v26  ;;  %v784_v29 = vadd.f32 %v783_v27, %v743_v25 }
 0x152   :  { %v785_v30 = vpop.f32.mrf.mxu0 }
 0x153   :  { %v825_v31 = vadd.f32 %v824_v11, %v784_v29  ;;  %v829_v32 = vmax.f32 %v823_v28, 0.0 }
 0x154   :  { %v786_v33 = vpop.f32.mrf.mxu0 }
 0x155   :  { %v830_v34 = vmax.f32 %v825_v31, 0.0  ;;  %v831_v37 = vpack.c.bf16 %v829_v32, %v829_v32 }
 0x157   :  { %v832_v35 = vpack.c.bf16 %v830_v34, %v830_v34 }
 0x159   :  { %1000 = vmatprep.mubr.bf16.mxu1 %v832_v35 }
 0x15a   :  { %1001 = vmatmul.mubr.bf16.vlgmr.msra.gmra.mxu1 %v831_v37 }
 0x15b   :  { %1380 = vmatpush3.bf16.msra.mxu1 %v1580_v36  ;;  %1395 = vmatprep.mubr.msk.bf16.mxu1 %vm1619_vm1, %v1618_v1 }
 0x15c   :  { %1381 = vmatprep.subr.bf16.mxu1 %v1618_v1 }
 0x15f   :  { %1382 = vmatpush3.bf16.msra.mxu1 %v1581_v38 }
 0x160   :  { %1383 = vmatprep.subr.bf16.mxu1 %v1618_v1 }
 0x163   :  { %1384 = vmatpush3.bf16.msra.mxu1 %v1582_v39 }
 0x164   :  { %1385 = vmatprep.subr.bf16.mxu1 %v1618_v1 }
 0x167   :  { %1386 = vmatpush3.bf16.msra.mxu1 %v1583_v40 }
 0x168   :  { %1387 = vmatprep.subr.bf16.mxu1 %v1618_v1 }
 0x16b   :  { %1388 = vmatpush3.bf16.msra.mxu1 %v1584_v41 }
 0x16c   :  { %1389 = vmatprep.subr.bf16.mxu1 %v1618_v1 }
 0x16f   :  { %1390 = vmatpush3.bf16.msra.mxu1 %v1585_v42 }
 0x170   :  { %1391 = vmatprep.subr.bf16.mxu1 %v1618_v1 }
 0x173   :  { %1392 = vmatpush3.bf16.msra.mxu1 %v1586_v43 }
 0x174   :  { %1393 = vmatprep.subr.bf16.mxu1 %v1618_v1  ;;  %v1337_v1 = vld [vmem:[%s1816_s8] ss:$0 sm:$0xff] }
 0x177   :  { %1394 = vmatpush3.bf16.msra.mxu1 %v1587_v44 }
 0x21a   :  { %v1359_v47 = vpop.f32.mrf.mxu1 }
 0x21c   :  { %v1360_v49 = vpop.f32.mrf.mxu1 }
 0x21d   :  { %v1361_v50 = vadd.f32 %v1360_v49, %v1359_v47 }
 0x21e   :  { %v1362_v51 = vpop.f32.mrf.mxu1 }
 0x21f   :  { %v1003_v52 = vadd.f32 %v1361_v50, %v1311_v48 }
 0x220   :  { %v1363_v53 = vpop.f32.mrf.mxu1 }
 0x221   :  { %v1008_v54 = vmax.f32 %v1003_v52, 0.0 }
 0x223   :  { %v1009_v55 = vpack.c.bf16 %v1008_v54, %v1008_v54 }
 0x225   :  { %1396 = vmatmul.mubr.bf16.vlgmr.msra.gmra.mxu1 %v1009_v55 }
 0x2e5   :  { %v1115_v59 = vpop.f32.mrf.mxu1 }
 0x2e6   :  { %v1116_v60 = vadd.f32 %v1328_v58, %v1115_v59 }
 0x2e7   :  { %v1397_v61 = vpop.f32.mrf.mxu1 }
 0x2e8   :  { %v1121_v62 = vmax.f32 %v1116_v60, 0.0 }
 0x2e9   :  { %v1118_v63 = vpop.f32.mrf.mxu1 }
 0x2ea   :  { %v1122_v0 = vpack.c.bf16 %v1121_v62, %v1121_v62 }
 0x2eb   :  { %v1398_v2 = vpop.f32.mrf.mxu1 }
 0x2ec   :  { %1408 = vmatmul.mubr.msk.bf16.vlgmr.msra.gmra.mxu0 %vm1162_vm2, %v1122_v0 }
 0x3ac   :  { %v1200_v3 = vpop.f32.mrf.mxu0 }
 0x3ad   :  { %v1201_v4 = vadd.f32 %v1337_v1, %v1200_v3 }
 0x3ae   :  { %v1409_v5 = vpop.f32.mrf.mxu0 }
 0x3af   :  { %1206 = vst [vmem:[%s1817_s9] sm:$0xff] %v1201_v4 }
 0x3b0   :  { %v1203_v6 = vpop.f32.mrf.mxu0 }
 0x3b2   :  { %v1410_v7 = vpop.f32.mrf.mxu0 }
 0x3b3   :  { %1211 = vsyncpa [#allocation3], 1 }

</bundles_post_ra>
